<compile_context>
chip_gen: v7x
topology: tpu7x:2x2x1
jax: 0.10.0
libtpu: 0.0.40
codegen_flags: <defaults>
</compile_context>

<pallas_src>
import functools

import jax
import jax.numpy as jnp
from jax.experimental import pallas as pl
from jax.experimental.pallas import tpu as pltpu

D_IN, D_H1, D_H2, D_OUT = 900, 128, 32, 2
D_OUT_PAD = 128  # MXU-friendly width for the last matmul only (store is (tm, 2))


def _round_up(x, m):
    return (x + m - 1) // m * m


def _tensorcores_per_chip():
    """2 on v7x (two TensorCores/chip), 1 on v5e/v6e. Fail-safe default: 1."""
    try:
        kind = jax.devices()[0].device_kind.lower()
    except Exception:
        return 1
    return 2 if ("v7" in kind or "7x" in kind) else 1


def _mlp_kernel(x_ref, w1_ref, b1_ref, w2_ref, b2_ref, w3_ref, b3_ref, o_ref):
    # Hot path: 3 MXU matmuls (bf16 operands, f32 accumulation) + VPU bias/ReLU.
    # x arrives as f32 (no wrapper-side cast pass); downcast here is hidden
    # under the input DMA on the otherwise-idle VPU.
    x = x_ref[...].astype(jnp.bfloat16)                               # (tm, 900)
    h1 = jnp.dot(x, w1_ref[...], preferred_element_type=jnp.float32) + b1_ref[...]
    h1 = jnp.maximum(h1, 0.0)
    h2 = jnp.dot(h1.astype(jnp.bfloat16), w2_ref[...],
                 preferred_element_type=jnp.float32) + b2_ref[...]
    h2 = jnp.maximum(h2, 0.0)
    out = jnp.dot(h2.astype(jnp.bfloat16), w3_ref[...],
                  preferred_element_type=jnp.float32)                 # (tm, 128)
    # Only the 2 real output columns are stored: 8 B/row of HBM writeback.
    o_ref[...] = (out[:, :D_OUT] + b3_ref[...]).astype(o_ref.dtype)   # (tm, 2)


@functools.partial(jax.jit, static_argnames=("tm",))
def img_feat_forward(x, params, *, tm=1024):
    """x: (B, N, 900) float32. Returns (features (B, N*2), None)."""
    w1, b1, w2, b2, w3, b3 = params
    B, N, d_in = x.shape
    assert d_in == D_IN
    M = B * N

    # --- per-generation tile / grid sizing (trace-time Python) -------------
    n_tc = _tensorcores_per_chip()
    m_cap = _round_up(M, 8)                      # smallest legal tile covering all rows
    if n_tc >= 2 and M > 8:
        # v7x: even number of grid steps so both TensorCores stay busy.
        steps = max(2, 2 * pl.cdiv(M, 2 * tm))
    else:
        # v5e/v6e: single TC -> grid is a serial loop; one big tile if it fits.
        steps = max(1, pl.cdiv(M, tm))
    tm_eff = min(_round_up(pl.cdiv(M, steps), 8), m_cap)
    grid = pl.cdiv(M, tm_eff)                    # ragged last block handled by Pallas

    # --- operands (weights are tiny; one cheap bf16 cast in the wrapper) ----
    x2d = x.reshape(M, D_IN)                     # f32, no cast / no pad here
    w1b = w1.astype(jnp.bfloat16)
    w2b = w2.astype(jnp.bfloat16)
    # Pad W3 to 128 output lanes for the MXU matmul only; padded columns are
    # never stored (kernel slices [:, :2] before the write).
    w3p = jnp.pad(w3, ((0, 0), (0, D_OUT_PAD - D_OUT))).astype(jnp.bfloat16)

    out2d = pl.pallas_call(
        _mlp_kernel,
        out_shape=jax.ShapeDtypeStruct((M, D_OUT), jnp.float32),
        grid_spec=pltpu.PrefetchScalarGridSpec(
            num_scalar_prefetch=0,
            grid=(grid,),
            in_specs=[
                pl.BlockSpec((tm_eff, D_IN), lambda i: (i, 0)),      # x rows (f32)
                pl.BlockSpec((D_IN, D_H1), lambda i: (0, 0)),        # W1 (resident)
                pl.BlockSpec((1, D_H1), lambda i: (0, 0)),           # b1
                pl.BlockSpec((D_H1, D_H2), lambda i: (0, 0)),        # W2 (resident)
                pl.BlockSpec((1, D_H2), lambda i: (0, 0)),           # b2
                pl.BlockSpec((D_H2, D_OUT_PAD), lambda i: (0, 0)),   # W3 (padded, resident)
                pl.BlockSpec((1, D_OUT), lambda i: (0, 0)),          # b3
            ],
            out_specs=pl.BlockSpec((tm_eff, D_OUT), lambda i: (i, 0)),
        ),
        compiler_params=pltpu.CompilerParams(
            dimension_semantics=("parallel",),
        ),
    )(x2d, w1b, b1, w2b, b2, w3p, b3)

    # nn.Flatten(start_dim=1): (M, 2) -> (B, N*2). Pure reshape, no slice pass.
    feats = out2d.reshape(B, N * D_OUT)
    return feats, None


def init_params(key):
    """Deterministic init mimicking PyTorch Linear default (U(-1/sqrt(fan_in), +))."""
    ks = jax.random.split(key, 6)

    def lin(kw, kb, fan_in, fan_out):
        bound = 1.0 / jnp.sqrt(fan_in)
        # stored as (in, out) so the kernel does x @ W
        w = jax.random.uniform(kw, (fan_in, fan_out), jnp.float32, -bound, bound)
        b = jax.random.uniform(kb, (1, fan_out), jnp.float32, -bound, bound)
        return w, b

    w1, b1 = lin(ks[0], ks[1], D_IN, D_H1)
    w2, b2 = lin(ks[2], ks[3], D_H1, D_H2)
    w3, b3 = lin(ks[4], ks[5], D_H2, D_OUT)
    return (w1, b1, w2, b2, w3, b3)


def _reference_f32(x2d, params):
    w1, b1, w2, b2, w3, b3 = params
    h = jnp.maximum(x2d @ w1 + b1, 0.0)
    h = jnp.maximum(h @ w2 + b2, 0.0)
    return h @ w3 + b3


def _reference_bf16_matched(x2d, params):
    # Mirrors the kernel's bf16-operand / f32-accumulate arithmetic.
    w1, b1, w2, b2, w3, b3 = params
    bf, f32 = jnp.bfloat16, jnp.float32
    xb = x2d.astype(bf).astype(f32)
    h = jnp.maximum(xb @ w1.astype(bf).astype(f32) + b1, 0.0).astype(bf).astype(f32)
    h = jnp.maximum(h @ w2.astype(bf).astype(f32) + b2, 0.0).astype(bf).astype(f32)
    return h @ w3.astype(bf).astype(f32) + b3


if __name__ == "__main__":
    key = jax.random.PRNGKey(0)
    k_x, k_p = jax.random.split(key)

    # Small shapes consistent with the module: (B=2, N=16 tokens, 900 features).
    B, N = 2, 16
    x = jax.random.normal(k_x, (B, N, D_IN), dtype=jnp.float32)
    params = init_params(k_p)

    feats, aux = img_feat_forward(x, params)
    feats = jax.block_until_ready(feats)

    assert feats.shape == (B, N * D_OUT), feats.shape
    assert aux is None

    x2d = x.reshape(B * N, D_IN)
    ref_match = _reference_bf16_matched(x2d, params).reshape(B, N * D_OUT)
    ref_f32 = _reference_f32(x2d, params).reshape(B, N * D_OUT)
    # Tight check vs a reference that mirrors the kernel's bf16/f32 arithmetic,
    # plus a loose sanity check vs the pure-f32 PyTorch-equivalent math.
    assert jnp.allclose(feats, ref_match, atol=1e-2, rtol=1e-2), "mismatch vs bf16-matched reference"
    assert jnp.allclose(feats, ref_f32, atol=1e-1, rtol=1e-1), "mismatch vs f32 reference"

    print("KERNEL_OK")
</pallas_src>

<mosaic_0001>
module attributes {stable_mosaic.version = 11 : i64} {
  func.func @_mlp_kernel(%arg0: i32, %arg1: memref<32x900xf32, #tpu.memory_space<vmem>>, %arg2: memref<900x128xbf16, #tpu.memory_space<vmem>>, %arg3: memref<1x128xf32, #tpu.memory_space<vmem>>, %arg4: memref<128x32xbf16, #tpu.memory_space<vmem>>, %arg5: memref<1x32xf32, #tpu.memory_space<vmem>>, %arg6: memref<32x128xbf16, #tpu.memory_space<vmem>>, %arg7: memref<1x2xf32, #tpu.memory_space<vmem>>, %arg8: memref<32x2xf32, #tpu.memory_space<vmem>>) attributes {dimension_semantics = [#tpu.dimension_semantics<parallel>], iteration_bounds = array<i64: 1>, scalar_prefetch = 0 : i64, scratch_operands = 0 : i64, tpu.core_type = #tpu.core_type<tc>, window_params = [{transform_indices = @transform_0, window_bounds = array<i64: 32, 900>}, {pipeline_mode = #tpu.pipeline_mode<synchronous>, transform_indices = @transform_1, window_bounds = array<i64: 900, 128>}, {pipeline_mode = #tpu.pipeline_mode<synchronous>, transform_indices = @transform_2, window_bounds = array<i64: 1, 128>}, {pipeline_mode = #tpu.pipeline_mode<synchronous>, transform_indices = @transform_3, window_bounds = array<i64: 128, 32>}, {pipeline_mode = #tpu.pipeline_mode<synchronous>, transform_indices = @transform_4, window_bounds = array<i64: 1, 32>}, {pipeline_mode = #tpu.pipeline_mode<synchronous>, transform_indices = @transform_5, window_bounds = array<i64: 32, 128>}, {pipeline_mode = #tpu.pipeline_mode<synchronous>, transform_indices = @transform_6, window_bounds = array<i64: 1, 2>}, {transform_indices = @transform_7, window_bounds = array<i64: 32, 2>}]} {
    %c0 = arith.constant 0 : index
    %c0_0 = arith.constant 0 : index
    %0 = vector.load %arg1[%c0, %c0_0] : memref<32x900xf32, #tpu.memory_space<vmem>>, vector<32x900xf32>
    %1 = arith.truncf %0 : vector<32x900xf32> to vector<32x900xbf16>
    %c0_1 = arith.constant 0 : index
    %c0_2 = arith.constant 0 : index
    %2 = vector.load %arg2[%c0_1, %c0_2] : memref<900x128xbf16, #tpu.memory_space<vmem>>, vector<900x128xbf16>
    %cst = arith.constant dense<0.000000e+00> : vector<32x128xf32>
    %3 = tpu.matmul %1, %2, %cst {dimension_numbers = #tpu.dot_dimension_numbers<[1], [0], [0], [1], [0, 0, 1, 1], [], []>} : vector<32x900xbf16>, vector<900x128xbf16>, vector<32x128xf32> -> vector<32x128xf32>
    %c0_3 = arith.constant 0 : index
    %c0_4 = arith.constant 0 : index
    %4 = vector.load %arg3[%c0_3, %c0_4] : memref<1x128xf32, #tpu.memory_space<vmem>>, vector<1x128xf32>
    %5 = vector.broadcast %4 : vector<1x128xf32> to vector<32x128xf32>
    %6 = arith.addf %3, %5 : vector<32x128xf32>
    %cst_5 = arith.constant 0.000000e+00 : f32
    %7 = vector.broadcast %cst_5 : f32 to vector<32x128xf32>
    %8 = arith.maximumf %6, %7 : vector<32x128xf32>
    %9 = arith.truncf %8 : vector<32x128xf32> to vector<32x128xbf16>
    %c0_6 = arith.constant 0 : index
    %c0_7 = arith.constant 0 : index
    %10 = vector.load %arg4[%c0_6, %c0_7] : memref<128x32xbf16, #tpu.memory_space<vmem>>, vector<128x32xbf16>
    %cst_8 = arith.constant dense<0.000000e+00> : vector<32x32xf32>
    %11 = tpu.matmul %9, %10, %cst_8 {dimension_numbers = #tpu.dot_dimension_numbers<[1], [0], [0], [1], [0, 0, 1, 1], [], []>} : vector<32x128xbf16>, vector<128x32xbf16>, vector<32x32xf32> -> vector<32x32xf32>
    %c0_9 = arith.constant 0 : index
    %c0_10 = arith.constant 0 : index
    %12 = vector.load %arg5[%c0_9, %c0_10] : memref<1x32xf32, #tpu.memory_space<vmem>>, vector<1x32xf32>
    %13 = vector.broadcast %12 : vector<1x32xf32> to vector<32x32xf32>
    %14 = arith.addf %11, %13 : vector<32x32xf32>
    %cst_11 = arith.constant 0.000000e+00 : f32
    %15 = vector.broadcast %cst_11 : f32 to vector<32x32xf32>
    %16 = arith.maximumf %14, %15 : vector<32x32xf32>
    %17 = arith.truncf %16 : vector<32x32xf32> to vector<32x32xbf16>
    %c0_12 = arith.constant 0 : index
    %c0_13 = arith.constant 0 : index
    %18 = vector.load %arg6[%c0_12, %c0_13] : memref<32x128xbf16, #tpu.memory_space<vmem>>, vector<32x128xbf16>
    %cst_14 = arith.constant dense<0.000000e+00> : vector<32x128xf32>
    %19 = tpu.matmul %17, %18, %cst_14 {dimension_numbers = #tpu.dot_dimension_numbers<[1], [0], [0], [1], [0, 0, 1, 1], [], []>} : vector<32x32xbf16>, vector<32x128xbf16>, vector<32x128xf32> -> vector<32x128xf32>
    %20 = vector.extract_strided_slice %19 {offsets = [0, 0], sizes = [32, 2], strides = [1, 1]} : vector<32x128xf32> to vector<32x2xf32>
    %c0_15 = arith.constant 0 : index
    %c0_16 = arith.constant 0 : index
    %21 = vector.load %arg7[%c0_15, %c0_16] : memref<1x2xf32, #tpu.memory_space<vmem>>, vector<1x2xf32>
    %22 = vector.broadcast %21 : vector<1x2xf32> to vector<32x2xf32>
    %23 = arith.addf %20, %22 : vector<32x2xf32>
    %c0_17 = arith.constant 0 : index
    %c0_18 = arith.constant 0 : index
    %24 = vector.load %arg8[%c0_17, %c0_18] : memref<32x2xf32, #tpu.memory_space<vmem>>, vector<32x2xf32>
    tpu.vector_store %arg8[%c0_17, %c0_18], %23 {strides = array<i32>} : memref<32x2xf32, #tpu.memory_space<vmem>>, vector<32x2xf32>,
    return
  }
  func.func @transform_0(%arg0: i32) -> (i32, i32) {
    %c0_i32 = arith.constant 0 : i32
    %c0_i32_0 = arith.constant 0 : i32
    return %arg0, %c0_i32 : i32, i32
  }
  func.func @transform_1(%arg0: i32) -> (i32, i32) {
    %c0_i32 = arith.constant 0 : i32
    %c0_i32_0 = arith.constant 0 : i32
    %c0_i32_1 = arith.constant 0 : i32
    return %c0_i32, %c0_i32_0 : i32, i32
  }
  func.func @transform_2(%arg0: i32) -> (i32, i32) {
    %c0_i32 = arith.constant 0 : i32
    %c0_i32_0 = arith.constant 0 : i32
    %c0_i32_1 = arith.constant 0 : i32
    return %c0_i32, %c0_i32_0 : i32, i32
  }
  func.func @transform_3(%arg0: i32) -> (i32, i32) {
    %c0_i32 = arith.constant 0 : i32
    %c0_i32_0 = arith.constant 0 : i32
    %c0_i32_1 = arith.constant 0 : i32
    return %c0_i32, %c0_i32_0 : i32, i32
  }
  func.func @transform_4(%arg0: i32) -> (i32, i32) {
    %c0_i32 = arith.constant 0 : i32
    %c0_i32_0 = arith.constant 0 : i32
    %c0_i32_1 = arith.constant 0 : i32
    return %c0_i32, %c0_i32_0 : i32, i32
  }
  func.func @transform_5(%arg0: i32) -> (i32, i32) {
    %c0_i32 = arith.constant 0 : i32
    %c0_i32_0 = arith.constant 0 : i32
    %c0_i32_1 = arith.constant 0 : i32
    return %c0_i32, %c0_i32_0 : i32, i32
  }
  func.func @transform_6(%arg0: i32) -> (i32, i32) {
    %c0_i32 = arith.constant 0 : i32
    %c0_i32_0 = arith.constant 0 : i32
    %c0_i32_1 = arith.constant 0 : i32
    return %c0_i32, %c0_i32_0 : i32, i32
  }
  func.func @transform_7(%arg0: i32) -> (i32, i32) {
    %c0_i32 = arith.constant 0 : i32
    %c0_i32_0 = arith.constant 0 : i32
    return %arg0, %c0_i32 : i32, i32
  }
}

</mosaic_0001>

<bundles_post_ra>
// kernel: img_feat_forward.1
= control target key start
LH: loop header
LB: loop body
LE: loop exit
PB: predicated region body
PF: predicated region fallthrough
CT: control target
= control target key end

     0   :  { %v1233_v43 = vmov 0   ;;  %vm534_vm0 = vcmask 31744   ;;  %vm541_vm1 = vcmask 1041408   ;;  %vm889_vm2 = vcmask 261120   ;;  %s1603_s1 = inlined_call_operand.vmem [shape: bf16[900,128], index: 1, kind: input, shape index: {}]   ;;  %s1604_s0 = inlined_call_operand.vmem [shape: f32[32,900], index: 0, kind: input, shape index: {}]   ;;  %s1605_s3 = inlined_call_operand.vmem [shape: bf16[128,32], index: 3, kind: input, shape index: {}]   ;;  %s1606_s5 = inlined_call_operand.vmem [shape: bf16[32,128], index: 5, kind: input, shape index: {}]   ;;  %s1607_s2 = inlined_call_operand.vmem [shape: f32[1,128], index: 2, kind: input, shape index: {}]   ;;  %s1608_s4 = inlined_call_operand.vmem [shape: f32[1,32], index: 4, kind: input, shape index: {}]   ;;  %s1609_s6 = inlined_call_operand.vmem [shape: f32[1,2], index: 6, kind: input, shape index: {}]   ;;  %s1610_s7 = inlined_call_operand.vmem [shape: f32[32,2], index: 7, kind: output, shape index: {}]  }
   0x1   :  { %v1166_v0 = vld [vmem:[%s1603_s1 + $0x40] sm:$0xff]   ;;  %v1170_v4 = vld [vmem:[%s1603_s1 + $0x48] sm:$0xff]   ;;  %v1174_v8 = vld [vmem:[%s1603_s1 + $0x50] sm:$0xff]   ;;  %vm956_vm3 = vcmask 15360  }
   0x2   :  { %v1167_v1 = vld [vmem:[%s1603_s1 + $0xc0] sm:$0xff]   ;;  %1039 = vmatprep.subr.bf16.mxu0 %v1166_v0  ;;  %v1171_v5 = vld [vmem:[%s1603_s1 + $0xc8] sm:$0xff]   ;;  %v1175_v9 = vld [vmem:[%s1603_s1 + $0xd0] sm:$0xff]  }
   0x3   :  { %v1168_v2 = vld [vmem:[%s1603_s1] sm:$0xff]   ;;  %1067 = vmatprep.subr.bf16.mxu1 %v1167_v1  ;;  %v1172_v6 = vld [vmem:[%s1603_s1 + $0x8] sm:$0xff]   ;;  %v1176_v10 = vld [vmem:[%s1603_s1 + $0x10] sm:$0xff]  }
   0x4   :  { %v1169_v3 = vld [vmem:[%s1603_s1 + $0x80] sm:$0xff]   ;;  %1040 = vmatpush3.bf16.msra.mxu0 %v1168_v2  ;;  %v1173_v7 = vld [vmem:[%s1603_s1 + $0x88] sm:$0xff]   ;;  %v1177_v11 = vld [vmem:[%s1603_s1 + $0x90] sm:$0xff]  }
   0x5   :  { %1068 = vmatpush3.bf16.msra.mxu1 %v1169_v3  ;;  %1041 = vmatprep.subr.bf16.mxu0 %v1170_v4  ;;  %v1178_v12 = vld [vmem:[%s1603_s1 + $0x58] sm:$0xff]   ;;  %v1182_v16 = vld [vmem:[%s1603_s1 + $0x60] sm:$0xff]   ;;  %v1186_v20 = vld [vmem:[%s1603_s1 + $0x68] sm:$0xff]  }
   0x6   :  { %1069 = vmatprep.subr.bf16.mxu1 %v1171_v5  ;;  %v1179_v13 = vld [vmem:[%s1603_s1 + $0xd8] sm:$0xff]   ;;  %v1183_v17 = vld [vmem:[%s1603_s1 + $0xe0] sm:$0xff]   ;;  %v1187_v21 = vld [vmem:[%s1603_s1 + $0xe8] sm:$0xff]  }
   0x7   :  { %v1180_v14 = vld [vmem:[%s1603_s1 + $0x18] sm:$0xff]   ;;  %v1184_v18 = vld [vmem:[%s1603_s1 + $0x20] sm:$0xff]   ;;  %v1188_v22 = vld [vmem:[%s1603_s1 + $0x28] sm:$0xff]  }
   0x8   :  { %1042 = vmatpush3.bf16.msra.mxu0 %v1172_v6  ;;  %v1181_v15 = vld [vmem:[%s1603_s1 + $0x98] sm:$0xff]   ;;  %v1185_v19 = vld [vmem:[%s1603_s1 + $0xa0] sm:$0xff]   ;;  %v1189_v23 = vld [vmem:[%s1603_s1 + $0xa8] sm:$0xff]  }
   0x9   :  { %1070 = vmatpush3.bf16.msra.mxu1 %v1173_v7  ;;  %1043 = vmatprep.subr.bf16.mxu0 %v1174_v8  ;;  %v1190_v24 = vld [vmem:[%s1603_s1 + $0x70] sm:$0xff]   ;;  %v1194_v28 = vld [vmem:[%s1603_s1 + $0x78] sm:$0xff]   ;;  %v28_v32 = vld [vmem:[%s1604_s0 + $0x8] sm:$0xff] }
   0xa   :  { %1071 = vmatprep.subr.bf16.mxu1 %v1175_v9  ;;  %v1191_v25 = vld [vmem:[%s1603_s1 + $0xf0] sm:$0xff]   ;;  %v1195_v29 = vld [vmem:[%s1603_s1 + $0xf8] sm:$0xff]   ;;  %v36_v33 = vld [vmem:[%s1604_s0 + $0x48] sm:$0xff] }
   0xb   :  { %v1192_v26 = vld [vmem:[%s1603_s1 + $0x30] sm:$0xff]   ;;  %v1196_v30 = vld [vmem:[%s1603_s1 + $0x38] sm:$0xff]   ;;  %v60_v35 = vpack.c.bf16 %v36_v33, %v28_v32  ;;  %v27_v37 = vld [vmem:[%s1604_s0] sm:$0xff] }
   0xc   :  { %1044 = vmatpush3.bf16.msra.mxu0 %v1176_v10  ;;  %v1193_v27 = vld [vmem:[%s1603_s1 + $0xb0] sm:$0xff]   ;;  %v1197_v31 = vld [vmem:[%s1603_s1 + $0xb8] sm:$0xff]   ;;  %v35_v38 = vld [vmem:[%s1604_s0 + $0x40] sm:$0xff] }
   0xd   :  { %1072 = vmatpush3.bf16.msra.mxu1 %v1177_v11  ;;  %1045 = vmatprep.subr.bf16.mxu0 %v1178_v12  ;;  %v30_v34 = vld [vmem:[%s1604_s0 + $0x18] sm:$0xff]  ;;  %v59_v40 = vpack.c.bf16 %v35_v38, %v27_v37  ;;  %v29_v41 = vld [vmem:[%s1604_s0 + $0x10] sm:$0xff]  ;;  %v1198_v45 = vld [vmem:[%s1603_s1 + $0x140] sm:$0xff]  }
   0xe   :  { %1073 = vmatprep.subr.bf16.mxu1 %v1179_v13  ;;  %v38_v36 = vld [vmem:[%s1604_s0 + $0x58] sm:$0xff]  ;;  %v37_v42 = vld [vmem:[%s1604_s0 + $0x50] sm:$0xff]  ;;  %577 = vmatprep.mubr.bf16.mxu0 %v60_v35  ;;  %v1199_v46 = vld [vmem:[%s1603_s1 + $0x100] sm:$0xff]  }
   0xf   :  { %v62_v39 = vpack.c.bf16 %v38_v36, %v30_v34  ;;  %v61_v44 = vpack.c.bf16 %v37_v42, %v29_v41  ;;  %v1200_v47 = vld [vmem:[%s1603_s1 + $0x180] sm:$0xff]   ;;  %v1201_v48 = vld [vmem:[%s1603_s1 + $0x148] sm:$0xff]   ;;  %v1204_v51 = vld [vmem:[%s1603_s1 + $0x150] sm:$0xff]  }
  0x10   :  { %1046 = vmatpush3.bf16.msra.mxu0 %v1180_v14  ;;  %v1202_v49 = vld [vmem:[%s1603_s1 + $0x108] sm:$0xff]   ;;  %v1205_v52 = vld [vmem:[%s1603_s1 + $0x110] sm:$0xff]   ;;  %v1207_v54 = vld [vmem:[%s1603_s1 + $0x158] sm:$0xff]  }
  0x11   :  { %1074 = vmatpush3.bf16.msra.mxu1 %v1181_v15  ;;  %1047 = vmatprep.subr.bf16.mxu0 %v1182_v16  ;;  %v1203_v50 = vld [vmem:[%s1603_s1 + $0x188] sm:$0xff]   ;;  %v1206_v53 = vld [vmem:[%s1603_s1 + $0x190] sm:$0xff]   ;;  %v1208_v55 = vld [vmem:[%s1603_s1 + $0x118] sm:$0xff]  }
  0x12   :  { %1075 = vmatprep.subr.bf16.mxu1 %v1183_v17  ;;  %626 = vmatprep.mubr.bf16.mxu1 %v62_v39  ;;  %v1209_v56 = vld [vmem:[%s1603_s1 + $0x198] sm:$0xff]   ;;  %v1210_v57 = vld [vmem:[%s1603_s1 + $0x160] sm:$0xff]   ;;  %v44_v60 = vld [vmem:[%s1604_s0 + $0x88] sm:$0xff] }
  0x13   :  { %v1211_v58 = vld [vmem:[%s1603_s1 + $0x120] sm:$0xff]   ;;  %v52_v61 = vld [vmem:[%s1604_s0 + $0xc8] sm:$0xff]  ;;  %v46_v5 = vld [vmem:[%s1604_s0 + $0x98] sm:$0xff] }
  0x14   :  { %1048 = vmatpush3.bf16.msra.mxu0 %v1184_v18  ;;  %v1212_v59 = vld [vmem:[%s1603_s1 + $0x1a0] sm:$0xff]   ;;  %v68_v62 = vpack.c.bf16 %v52_v61, %v44_v60  ;;  %v1213_v63 = vld [vmem:[%s1603_s1 + $0x168] sm:$0xff]   ;;  %v54_v6 = vld [vmem:[%s1604_s0 + $0xd8] sm:$0xff] }
  0x15   :  { %1076 = vmatpush3.bf16.msra.mxu1 %v1185_v19  ;;  %1049 = vmatprep.subr.bf16.mxu0 %v1186_v20  ;;  %v43_v0 = vld [vmem:[%s1604_s0 + $0x80] sm:$0xff]  ;;  %v1214_v3 = vld [vmem:[%s1603_s1 + $0x128] sm:$0xff]   ;;  %v45_v7 = vld [vmem:[%s1604_s0 + $0x90] sm:$0xff]  ;;  %v70_v8 = vpack.c.bf16 %v54_v6, %v46_v5 }
  0x16   :  { %1077 = vmatprep.subr.bf16.mxu1 %v1187_v21  ;;  %v51_v1 = vld [vmem:[%s1604_s0 + $0xc0] sm:$0xff]  ;;  %v1215_v4 = vld [vmem:[%s1603_s1 + $0x1a8] sm:$0xff]   ;;  %v53_v9 = vld [vmem:[%s1604_s0 + $0xd0] sm:$0xff] }
  0x17   :  { %v67_v2 = vpack.c.bf16 %v51_v1, %v43_v0  ;;  %v69_v10 = vpack.c.bf16 %v53_v9, %v45_v7  ;;  %v1216_v11 = vld [vmem:[%s1603_s1 + $0x170] sm:$0xff]   ;;  %v1219_v14 = vld [vmem:[%s1603_s1 + $0x178] sm:$0xff]   ;;  %v32_v16 = vld [vmem:[%s1604_s0 + $0x28] sm:$0xff] }
  0x18   :  { %1050 = vmatpush3.bf16.msra.mxu0 %v1188_v22  ;;  %v1217_v12 = vld [vmem:[%s1603_s1 + $0x130] sm:$0xff]   ;;  %v1220_v15 = vld [vmem:[%s1603_s1 + $0x138] sm:$0xff]   ;;  %v40_v17 = vld [vmem:[%s1604_s0 + $0x68] sm:$0xff] }
  0x19   :  { %1078 = vmatpush3.bf16.msra.mxu1 %v1189_v23  ;;  %1051 = vmatprep.subr.bf16.mxu0 %v1190_v24  ;;  %v1218_v13 = vld [vmem:[%s1603_s1 + $0x1b0] sm:$0xff]   ;;  %v64_v18 = vpack.c.bf16 %v40_v17, %v32_v16  ;;  %v31_v19 = vld [vmem:[%s1604_s0 + $0x20] sm:$0xff]  ;;  %v1221_v21 = vld [vmem:[%s1603_s1 + $0x1b8] sm:$0xff]  }
  0x1a   :  { %1079 = vmatprep.subr.bf16.mxu1 %v1191_v25  ;;  %v39_v20 = vld [vmem:[%s1604_s0 + $0x60] sm:$0xff]  ;;  %v34_v22 = vld [vmem:[%s1604_s0 + $0x38] sm:$0xff]  ;;  %v57_v41 = vld [vmem:[%s1604_s0 + $0xf0] sm:$0xff] }
  0x1b   :  { %v42_v23 = vld [vmem:[%s1604_s0 + $0x78] sm:$0xff]  ;;  %v1222_v24 = vld [vmem:[%s1603_s1 + $0x1c0] ss:$0 sps:$4 sm:$0x33]  }
  0x1c   :  { %1052 = vmatpush3.bf16.msra.mxu0 %v1192_v26  ;;  %v66_v25 = vpack.c.bf16 %v42_v23, %v34_v22  ;;  %v48_v26 = vld [vmem:[%s1604_s0 + $0xa8] sm:$0xff]  ;;  %v543_v32 = vsel %vm541_vm1, %v1222_v24, 0  ;;  %v50_v33 = vld [vmem:[%s1604_s0 + $0xb8] sm:$0xff]  ;;  %v47_v36 = vld [vmem:[%s1604_s0 + $0xa0] sm:$0xff] }
  0x1d   :  { %1080 = vmatpush3.bf16.msra.mxu1 %v1193_v27  ;;  %1053 = vmatprep.subr.bf16.mxu0 %v1194_v28  ;;  %v63_v27 = vpack.c.bf16 %v39_v20, %v31_v19  ;;  %v56_v28 = vld [vmem:[%s1604_s0 + $0xe8] sm:$0xff]  ;;  %v58_v34 = vld [vmem:[%s1604_s0 + $0xf8] sm:$0xff]  ;;  %v55_v37 = vld [vmem:[%s1604_s0 + $0xe0] sm:$0xff] }
  0x1e   :  { %1081 = vmatprep.subr.bf16.mxu1 %v1195_v29  ;;  %v72_v29 = vpack.c.bf16 %v56_v28, %v48_v26  ;;  %v74_v38 = vpack.c.bf16 %v58_v34, %v50_v33  ;;  %v71_v39 = vpack.c.bf16 %v55_v37, %v47_v36 }
  0x20   :  { %1054 = vmatpush3.bf16.msra.mxu0 %v1196_v30  ;;  %v33_v30 = vld [vmem:[%s1604_s0 + $0x30] sm:$0xff] }
  0x21   :  { %1082 = vmatpush3.bf16.msra.mxu1 %v1197_v31  ;;  %1095 = vmatprep.subr.bf16.mxu0 %v1198_v45  ;;  %v41_v31 = vld [vmem:[%s1604_s0 + $0x70] sm:$0xff] }
  0x22   :  { %692 = vmatprep.subr.bf16.mxu1 %v1233_v43  ;;  %v65_v35 = vpack.c.bf16 %v41_v31, %v33_v30  ;;  %v1225_v45 = vld [vmem:[%s1605_s3 + $0x10] sm:$0xff]  }
  0x23   :  { %578 = vmatmul.mubr.bf16.vlgmr.msra.gmra.mrb[0].mxu0 %v59_v40  ;;  %v49_v40 = vld [vmem:[%s1604_s0 + $0xb0] sm:$0xff] }
  0x24   :  { %627 = vmatmul.mubr.bf16.vlgmr.msra.gmra.mrb[0].mxu1 %v61_v44  ;;  %1096 = vmatpush3.bf16.msra.mxu0 %v1199_v46  ;;  %v73_v42 = vpack.c.bf16 %v57_v41, %v49_v40  ;;  %v1224_v44 = vld [vmem:[%s1605_s3 + $0x8] sm:$0xff]   ;;  %v1226_v46 = vld [vmem:[%s1605_s3 + $0x18] sm:$0xff]  }
  0x25   :  { %693 = vmatpush1.bf16.msra.mxu1 %v1200_v47  ;;  %1097 = vmatprep.subr.bf16.mxu0 %v1201_v48  ;;  %v1227_v47 = vld [vmem:[%s1605_s3 + $0x20] sm:$0xff]   ;;  %v1228_v48 = vld [vmem:[%s1605_s3 + $0x28] sm:$0xff]  }
  0x26   :  { %694 = vmatprep.subr.bf16.mxu1 %v1233_v43  ;;  %585 = vmatprep.mubr.bf16.mxu0 %v68_v62 }
  0x27   :  { %634 = vmatprep.mubr.bf16.mxu1 %v70_v8 }
  0x28   :  { %1098 = vmatpush3.bf16.msra.mxu0 %v1202_v49  ;;  %v1229_v49 = vld [vmem:[%s1605_s3 + $0x30] sm:$0xff]  }
  0x29   :  { %695 = vmatpush1.bf16.msra.mxu1 %v1203_v50  ;;  %1099 = vmatprep.subr.bf16.mxu0 %v1204_v51  ;;  %v1230_v50 = vld [vmem:[%s1605_s3 + $0x38] sm:$0xff]   ;;  %v1231_v51 = vld [vmem:[%s1606_s5] sm:$0xff]  }
  0x2a   :  { %696 = vmatprep.subr.bf16.mxu1 %v1233_v43 }
  0x2b   :  { %586 = vmatmul.mubr.bf16.gmra.mrb[4].mxu0 %v67_v2 }
  0x2c   :  { %1100 = vmatpush3.bf16.msra.mxu0 %v1205_v52  ;;  %635 = vmatmul.mubr.bf16.gmra.mrb[4].mxu1 %v69_v10 }
  0x2d   :  { %697 = vmatpush1.bf16.msra.mxu1 %v1206_v53  ;;  %1101 = vmatprep.subr.bf16.mxu0 %v1207_v54  ;;  %v965_v54 = vld [vmem:[%s1607_s2] ss:$0 sm:$0xff] }
  0x2e   :  { %698 = vmatprep.subr.bf16.mxu1 %v1233_v43  ;;  %675 = vmatprep.mubr.bf16.mxu0 %v64_v18 }
  0x2f   :  { %1023 = vmatprep.mubr.msk.bf16.mxu1 %vm534_vm0, %v66_v25 }
  0x30   :  { %1102 = vmatpush3.bf16.msra.mxu0 %v1208_v55 }
  0x31   :  { %699 = vmatpush1.bf16.msra.mxu1 %v1209_v56  ;;  %1103 = vmatprep.subr.bf16.mxu0 %v1210_v57 }
  0x32   :  { %700 = vmatprep.subr.bf16.mxu1 %v1233_v43 }
  0x34   :  { %1104 = vmatpush3.bf16.msra.mxu0 %v1211_v58 }
  0x35   :  { %701 = vmatpush1.bf16.msra.mxu1 %v1212_v59  ;;  %1105 = vmatprep.subr.bf16.mxu0 %v1213_v63 }
  0x36   :  { %702 = vmatprep.subr.bf16.mxu1 %v1233_v43 }
  0x38   :  { %1106 = vmatpush3.bf16.msra.mxu0 %v1214_v3 }
  0x39   :  { %703 = vmatpush1.bf16.msra.mxu1 %v1215_v4  ;;  %1107 = vmatprep.subr.bf16.mxu0 %v1216_v11 }
  0x3a   :  { %704 = vmatprep.subr.bf16.mxu1 %v1233_v43 }
  0x3c   :  { %1108 = vmatpush3.bf16.msra.mxu0 %v1217_v12 }
  0x3d   :  { %705 = vmatpush1.bf16.msra.mxu1 %v1218_v13  ;;  %1109 = vmatprep.subr.bf16.mxu0 %v1219_v14 }
  0x3e   :  { %706 = vmatprep.subr.bf16.mxu1 %v1233_v43 }
  0x40   :  { %1110 = vmatpush3.bf16.msra.mxu0 %v1220_v15 }
  0x41   :  { %707 = vmatpush1.bf16.msra.mxu1 %v1221_v21 }
  0x42   :  { %708 = vmatprep.subr.bf16.mxu1 %v1233_v43  ;;  %v1223_v43 = vld [vmem:[%s1605_s3] sm:$0xff]  }
  0x43   :  { %676 = vmatmul.mubr.bf16.vlgmr.msra.gmra.mrb[8].mxu0 %v63_v27  ;;  %1137 = vmatprep.subr.bf16.mxu0 %v1223_v43 }
  0x44   :  { %683 = vmatprep.mubr.bf16.mxu0 %v72_v29  ;;  %1138 = vmatpush3.bf16.msra.mxu0 %v1223_v43 }
  0x45   :  { %709 = vmatpush1.bf16.msra.mxu1 %v543_v32  ;;  %1139 = vmatprep.subr.bf16.mxu0 %v1224_v44 }
  0x46   :  { %1157 = vmatprep.subr.bf16.mxu1 %v1231_v51 }
  0x48   :  { %725 = vmatmul.mubr.bf16.vlgmr.msra.gmra.mrb[8].mxu1 %v65_v35  ;;  %1140 = vmatpush3.bf16.msra.mxu0 %v1224_v44 }
  0x49   :  { %1024 = vmatprep.mubr.msk.bf16.mxu1 %vm534_vm0, %v74_v38  ;;  %1141 = vmatprep.subr.bf16.mxu0 %v1225_v45 }
  0x4a   :  { %1158 = vmatpush3.bf16.msra.mxu1 %v1231_v51 }
  0x4b   :  { %684 = vmatmul.mubr.bf16.gmra.mrb[12].mxu0 %v71_v39 }
  0x4c   :  { %1142 = vmatpush3.bf16.msra.mxu0 %v1225_v45 }
  0x4d   :  { %1143 = vmatprep.subr.bf16.mxu0 %v1226_v46 }
  0x50   :  { %733 = vmatmul.mubr.bf16.gmra.mrb[12].mxu1 %v73_v42  ;;  %1144 = vmatpush3.bf16.msra.mxu0 %v1226_v46 }
  0x51   :  { %1145 = vmatprep.subr.bf16.mxu0 %v1227_v47 }
  0x54   :  { %1146 = vmatpush3.bf16.msra.mxu0 %v1227_v47 }
  0x55   :  { %1147 = vmatprep.subr.bf16.mxu0 %v1228_v48 }
  0x58   :  { %1148 = vmatpush3.bf16.msra.mxu0 %v1228_v48 }
  0x59   :  { %1149 = vmatprep.subr.bf16.mxu0 %v1229_v49 }
  0x5c   :  { %1150 = vmatpush3.bf16.msra.mxu0 %v1229_v49 }
  0x5d   :  { %1151 = vmatprep.subr.bf16.mxu0 %v1230_v50 }
  0x60   :  { %1152 = vmatpush3.bf16.msra.mxu0 %v1230_v50 }
  0xf6   :  { %v1055_v52 = vpop.f32.mrb[0].mxu0 }
  0xf7   :  { %v1083_v53 = vpop.f32.mrb[0].mxu1  ;;  %v1056_v55 = vpop.f32.mrb[1].mxu0 }
  0xf8   :  { %v1057_v56 = vadd.f32 %v1056_v55, %v1055_v52  ;;  %v1084_v57 = vpop.f32.mrb[1].mxu1  ;;  %v1058_v58 = vpop.f32.mrb[2].mxu0  ;;  %v1232_v55 = vld [vmem:[%s1606_s5 + $0x8] sm:$0xff]  }
  0xf9   :  { %v1085_v59 = vadd.f32 %v1084_v57, %v1083_v53  ;;  %v1086_v60 = vpop.f32.mrb[2].mxu1  ;;  %v1059_v61 = vpop.f32.mrb[3].mxu0  ;;  %1159 = vmatprep.subr.bf16.mxu1 %v1232_v55 }
  0xfa   :  { %v580_v62 = vadd.f32 %v1057_v56, %v965_v54  ;;  %v1060_v63 = vadd.f32 %v1059_v61, %v1058_v58  ;;  %v1087_v0 = vpop.f32.mrb[3].mxu1  ;;  %1160 = vmatpush3.bf16.msra.mxu1 %v1232_v55  ;;  %v1025_v56 = vld [vmem:[%s1608_s4] ss:$0 sm:$0xff] }
  0xfb   :  { %v1088_v1 = vadd.f32 %v1087_v0, %v1086_v60 }
  0xfc   :  { %v629_v2 = vadd.f32 %v1085_v59, %v580_v62  ;;  %v583_v3 = vadd.f32 %v1060_v63, %v965_v54 }
  0xfe   :  { %v632_v4 = vadd.f32 %v1088_v1, %v583_v3  ;;  %v1061_v5 = vpop.f32.mrb[4].mxu0 }
  0xff   :  { %v1062_v6 = vpop.f32.mrb[5].mxu0  ;;  %v1089_v9 = vpop.f32.mrb[4].mxu1 }
 0x100   :  { %v1063_v7 = vadd.f32 %v1062_v6, %v1061_v5  ;;  %v1064_v8 = vpop.f32.mrb[6].mxu0  ;;  %v1090_v11 = vpop.f32.mrb[5].mxu1 }
 0x101   :  { %v1065_v10 = vpop.f32.mrb[7].mxu0  ;;  %v1091_v14 = vadd.f32 %v1090_v11, %v1089_v9  ;;  %v1092_v15 = vpop.f32.mrb[6].mxu1 }
 0x102   :  { %v588_v12 = vadd.f32 %v1063_v7, %v965_v54  ;;  %v1066_v13 = vadd.f32 %v1065_v10, %v1064_v8  ;;  %v1093_v16 = vpop.f32.mrb[7].mxu1  ;;  %v1038_v7 = vld [vmem:[%s1609_s6] ss:$0 sm:$0xff] }
 0x103   :  { %v1094_v19 = vadd.f32 %v1093_v16, %v1092_v15 }
 0x104   :  { %v591_v17 = vadd.f32 %v1066_v13, %v965_v54  ;;  %v637_v18 = vadd.f32 %v1091_v14, %v588_v12 }
 0x106   :  { %v640_v20 = vadd.f32 %v1094_v19, %v591_v17 }
 0x116   :  { %v1111_v21 = vpop.f32.mrb[8].mxu0 }
 0x117   :  { %v1112_v22 = vpop.f32.mrb[9].mxu0 }
 0x118   :  { %v1113_v23 = vadd.f32 %v1112_v22, %v1111_v21  ;;  %v1114_v24 = vpop.f32.mrb[10].mxu0 }
 0x119   :  { %v1115_v25 = vpop.f32.mrb[11].mxu0 }
 0x11a   :  { %v1116_v26 = vadd.f32 %v1115_v25, %v1114_v24  ;;  %v678_v27 = vadd.f32 %v1113_v23, %v629_v2 }
 0x11b   :  { %v726_v28 = vpop.f32.mrb[8].mxu1 }
 0x11c   :  { %v727_v29 = vadd.f32 %v726_v28, %v678_v27  ;;  %v728_v30 = vpop.f32.mrb[9].mxu1  ;;  %v681_v31 = vadd.f32 %v1116_v26, %v632_v4 }
 0x11d   :  { %v729_v32 = vpop.f32.mrb[10].mxu1 }
 0x11e   :  { %v730_v33 = vadd.f32 %v729_v32, %v681_v31  ;;  %v731_v34 = vpop.f32.mrb[11].mxu1  ;;  %v1117_v35 = vpop.f32.mrb[12].mxu0  ;;  %v741_v37 = vmax.f32 %v727_v29, 0.0 }
 0x11f   :  { %v1118_v36 = vpop.f32.mrb[13].mxu0 }
 0x120   :  { %v742_v38 = vmax.f32 %v730_v33, 0.0  ;;  %v1119_v39 = vadd.f32 %v1118_v36, %v1117_v35  ;;  %v1120_v40 = vpop.f32.mrb[14].mxu0 }
 0x121   :  { %v1121_v41 = vpop.f32.mrb[15].mxu0 }
 0x122   :  { %v745_v42 = vpack.c.bf16 %v742_v38, %v741_v37  ;;  %v1122_v43 = vadd.f32 %v1121_v41, %v1120_v40  ;;  %v686_v44 = vadd.f32 %v1119_v39, %v637_v18 }
 0x123   :  { %v734_v45 = vpop.f32.mrb[12].mxu1 }
 0x124   :  { %v735_v46 = vadd.f32 %v734_v45, %v686_v44  ;;  %v736_v47 = vpop.f32.mrb[13].mxu1  ;;  %v689_v48 = vadd.f32 %v1122_v43, %v640_v20  ;;  %1153 = vmatprep.mubr.bf16.mxu0 %v745_v42 }
 0x125   :  { %v737_v49 = vpop.f32.mrb[14].mxu1 }
 0x126   :  { %v738_v50 = vadd.f32 %v737_v49, %v689_v48  ;;  %v739_v51 = vpop.f32.mrb[15].mxu1  ;;  %v743_v52 = vmax.f32 %v735_v46, 0.0 }
 0x128   :  { %v744_v53 = vmax.f32 %v738_v50, 0.0 }
 0x12a   :  { %v746_v54 = vpack.c.bf16 %v744_v53, %v743_v52 }
 0x12c   :  { %1154 = vmatmul.mubr.bf16.vlgmr.msra.gmra.mrb[16].mxu0 %v746_v54 }
 0x1ff   :  { %v1155_v57 = vpop.f32.mrb[16].mxu0 }
 0x200   :  { %v861_v58 = vadd.f32 %v1155_v57, %v1025_v56  ;;  %v852_v59 = vpop.f32.mrb[17].mxu0 }
 0x201   :  { %v853_v60 = vadd.f32 %v1025_v56, %v852_v59  ;;  %v1156_v61 = vpop.f32.mrb[18].mxu0 }
 0x202   :  { %v864_v62 = vadd.f32 %v1156_v61, %v1025_v56  ;;  %v855_v63 = vpop.f32.mrb[19].mxu0  ;;  %v869_v1 = vmax.f32 %v861_v58, 0.0 }
 0x203   :  { %v856_v0 = vadd.f32 %v1025_v56, %v855_v63  ;;  %v867_v3 = vmax.f32 %v853_v60, 0.0 }
 0x204   :  { %v870_v2 = vmax.f32 %v864_v62, 0.0 }
 0x205   :  { %v868_v4 = vmax.f32 %v856_v0, 0.0 }
 0x206   :  { %v872_v5 = vpack.c.bf16 %v870_v2, %v869_v1 }
 0x207   :  { %v871_v6 = vpack.c.bf16 %v868_v4, %v867_v3 }
 0x209   :  { %1161 = vmatprep.mubr.msk.bf16.mxu1 %vm889_vm2, %v871_v6 }
 0x20a   :  { %1162 = vmatmul.mubr.msk.bf16.vlgmr.msra.gmra.mrb[16].mxu1 %vm889_vm2, %v872_v5 }
 0x2dd   :  { %v1163_v8 = vpop.f32.mrb[16].mxu1 }
 0x2de   :  { %v954_v9 = vadd.f32 %v1163_v8, %v1038_v7  ;;  %v930_v10 = vpop.f32.mrb[17].mxu1 }
 0x2df   :  { %v952_v11 = vadd.f32 %v1038_v7, %v930_v10  ;;  %v1164_v12 = vpop.f32.mrb[18].mxu1 }
 0x2e0   :  { %959 = vst.msk [vmem:[%s1610_s7 + $0x10] sm:$0xff] %vm956_vm3, %v954_v9  ;;  %v955_v13 = vadd.f32 %v1164_v12, %v1038_v7  ;;  %v933_v14 = vpop.f32.mrb[19].mxu1 }
 0x2e1   :  { %957 = vst.msk [vmem:[%s1610_s7] sm:$0xff] %vm956_vm3, %v952_v11  ;;  %v953_v15 = vadd.f32 %v1038_v7, %v933_v14 }
 0x2e2   :  { %960 = vst.msk [vmem:[%s1610_s7 + $0x18] sm:$0xff] %vm956_vm3, %v955_v13 }
 0x2e3   :  { %958 = vst.msk [vmem:[%s1610_s7 + $0x8] sm:$0xff] %vm956_vm3, %v953_v15 }

</bundles_post_ra>
